<compile_context>
chip_gen: v5e
topology: v5e:2x2
jax: 0.10.0
libtpu: 0.0.40
codegen_flags: <defaults>
</compile_context>

<pallas_src>
import jax
import jax.numpy as jnp
from jax.experimental import pallas as pl
from jax.experimental.pallas import tpu as pltpu

_LANE = 128
_SUBLANE = 8


def _round_up(x, m):
    return (x + m - 1) // m * m


def _fused_multilayer_lstm_kernel(x_ref, h_ref, c_ref, *rest):
    """All LSTM layers of one time step, fully VMEM-resident.

    rest = (w_ih_0, w_hh_0, b_0, ..., w_ih_{L-1}, w_hh_{L-1}, b_{L-1},
            h_out_ref, c_out_ref)

      x_ref  : (B, D_in)     layer-0 input (f32)
      h_ref  : (L, B, Hp)    previous hidden states (f32)
      c_ref  : (L, B, Hp)    previous cell states (f32)
      w_ih_l : (D_l, 4*Hp)   input->gate weights, gate col order [i, f, o, g]
      w_hh_l : (Hp, 4*Hp)    hidden->gate weights, gate col order [i, f, o, g]
      b_l    : (1, 4*Hp)     b_ih + b_hh (f32), gate col order [i, f, o, g]
      h_out  : (L, B, Hp)
      c_out  : (L, B, Hp)
    """
    h_out_ref, c_out_ref = rest[-2], rest[-1]
    wb = rest[:-2]
    num_layers, _, Hp = h_ref.shape

    layer_in = x_ref[...]
    for l in range(num_layers):
        w_ih = wb[3 * l][...]
        w_hh = wb[3 * l + 1][...]
        b = wb[3 * l + 2][...]
        h_prev = h_ref[l]
        c_prev = c_ref[l]

        cd = w_ih.dtype
        # Two MXU pushes accumulating into one f32 result (no lane concat).
        gates = (
            jnp.dot(layer_in.astype(cd), w_ih, preferred_element_type=jnp.float32)
            + jnp.dot(h_prev.astype(cd), w_hh, preferred_element_type=jnp.float32)
            + b
        )

        # Gate order is [i, f, o, g]: ONE sigmoid over the leading 3*Hp lanes,
        # ONE tanh over the trailing Hp lanes; all slices are 128-lane aligned.
        sig = jax.nn.sigmoid(gates[:, : 3 * Hp])
        i_g = sig[:, 0 * Hp:1 * Hp]
        f_g = sig[:, 1 * Hp:2 * Hp]
        o_g = sig[:, 2 * Hp:3 * Hp]
        g_g = jnp.tanh(gates[:, 3 * Hp:])

        c_new = f_g * c_prev + i_g * g_g
        h_new = o_g * jnp.tanh(c_new)

        # Per-layer stores bound live ranges; no epilogue concatenation.
        h_out_ref[l] = h_new
        c_out_ref[l] = c_new

        layer_in = h_new  # F.dropout with p=0 is the identity.


def prepare_params(raw_params, hidden_size, param_dtype=jnp.bfloat16):
    """Convert torch.nn.LSTMCell-layout params into the kernel layout.

    Input per layer (PyTorch gate row order [i, f, g, o]):
        w_ih: (4H, D_l), w_hh: (4H, H), b_ih: (4H,), b_hh: (4H,)
    Output per layer (gate column order [i, f, o, g], each gate block padded
    to Hp lanes with zeros):
        w_ih: (D_l_pad, 4*Hp) param_dtype   (D_l_pad = D_l for layer 0, Hp after)
        w_hh: (Hp, 4*Hp)      param_dtype
        bias: (1, 4*Hp)       float32        (b_ih + b_hh)
    """
    H = hidden_size
    Hp = _round_up(H, _LANE)

    def reorder_pad_cols(m):  # m: (rows, 4H), torch col order [i, f, g, o]
        i = m[:, 0 * H:1 * H]
        f = m[:, 1 * H:2 * H]
        g = m[:, 2 * H:3 * H]
        o = m[:, 3 * H:4 * H]
        pad = lambda blk: jnp.pad(blk, ((0, 0), (0, Hp - H)))
        return jnp.concatenate([pad(i), pad(f), pad(o), pad(g)], axis=1)

    prepared = []
    for idx, p in enumerate(raw_params):
        w_ih_t = p["w_ih"].T                       # (D_l, 4H)
        w_hh_t = p["w_hh"].T                       # (H, 4H)
        if idx > 0:                                # layer input = padded hidden
            w_ih_t = jnp.pad(w_ih_t, ((0, Hp - H), (0, 0)))
        w_hh_t = jnp.pad(w_hh_t, ((0, Hp - H), (0, 0)))
        bias = (p["b_ih"] + p["b_hh"]).reshape(1, 4 * H)
        prepared.append({
            "w_ih": reorder_pad_cols(w_ih_t).astype(param_dtype),
            "w_hh": reorder_pad_cols(w_hh_t).astype(param_dtype),
            "bias": reorder_pad_cols(bias).astype(jnp.float32),
        })
    return prepared


def multi_layer_lstm_cell(x, hidden, cell, prepared_params):
    """Forward of MultiLayerLSTMCell.

    x:      (B, input_size) f32
    hidden: (L, B, H) f32
    cell:   (L, B, H) f32
    prepared_params: output of prepare_params()
    returns (hidden_out, cell_out), each (L, B, H) f32
    """
    L, B, H = hidden.shape
    Hp = _round_up(H, _LANE)
    Bp = _round_up(B, _SUBLANE)

    x_p = jnp.pad(x, ((0, Bp - B), (0, 0)))
    h_p = jnp.pad(hidden, ((0, 0), (0, Bp - B), (0, Hp - H)))
    c_p = jnp.pad(cell, ((0, 0), (0, Bp - B), (0, Hp - H)))

    flat = []
    for p in prepared_params:
        flat.extend([p["w_ih"], p["w_hh"], p["bias"]])

    def nbytes(a):
        return a.size * jnp.dtype(a.dtype).itemsize

    out_bytes = 2 * L * Bp * Hp * 4
    total = (nbytes(x_p) + nbytes(h_p) + nbytes(c_p)
             + sum(nbytes(t) for t in flat) + out_bytes)
    vmem_limit = int(min(64 * 1024 * 1024,
                         max(32 * 1024 * 1024, 2 * total + (4 << 20))))

    vmem = pl.BlockSpec(memory_space=pltpu.MemorySpace.VMEM)
    h_out, c_out = pl.pallas_call(
        _fused_multilayer_lstm_kernel,
        out_shape=(
            jax.ShapeDtypeStruct((L, Bp, Hp), jnp.float32),
            jax.ShapeDtypeStruct((L, Bp, Hp), jnp.float32),
        ),
        in_specs=[vmem] * (3 + 3 * L),
        out_specs=(vmem, vmem),
        compiler_params=pltpu.CompilerParams(vmem_limit_bytes=vmem_limit),
    )(x_p, h_p, c_p, *flat)

    return h_out[:, :B, :H], c_out[:, :B, :H]


def init_params(key, input_size, hidden_size, num_layers):
    """nn.LSTMCell-style init: uniform(-k, k), k = 1/sqrt(H); torch layout."""
    k = 1.0 / jnp.sqrt(hidden_size)
    params = []
    in_sz = input_size
    for _ in range(num_layers):
        key, k1, k2, k3, k4 = jax.random.split(key, 5)
        params.append({
            "w_ih": jax.random.uniform(k1, (4 * hidden_size, in_sz), jnp.float32, -k, k),
            "w_hh": jax.random.uniform(k2, (4 * hidden_size, hidden_size), jnp.float32, -k, k),
            "b_ih": jax.random.uniform(k3, (4 * hidden_size,), jnp.float32, -k, k),
            "b_hh": jax.random.uniform(k4, (4 * hidden_size,), jnp.float32, -k, k),
        })
        in_sz = hidden_size
    return params


def _reference(x, hidden, cell, raw_params):
    """Pure-JAX f32 reference, torch.nn.LSTMCell gate order [i, f, g, o]."""
    H = hidden.shape[-1]
    out_h, out_c = [], []
    layer_in = x
    for i, p in enumerate(raw_params):
        gates = layer_in @ p["w_ih"].T + hidden[i] @ p["w_hh"].T + p["b_ih"] + p["b_hh"]
        i_g = jax.nn.sigmoid(gates[:, 0 * H:1 * H])
        f_g = jax.nn.sigmoid(gates[:, 1 * H:2 * H])
        g_g = jnp.tanh(gates[:, 2 * H:3 * H])
        o_g = jax.nn.sigmoid(gates[:, 3 * H:4 * H])
        c_new = f_g * cell[i] + i_g * g_g
        h_new = o_g * jnp.tanh(c_new)
        out_h.append(h_new)
        out_c.append(c_new)
        layer_in = h_new
    return jnp.stack(out_h), jnp.stack(out_c)


if __name__ == "__main__":
    B = 8
    input_size = 16
    hidden_size = 32
    num_layers = 2

    key = jax.random.PRNGKey(0)
    key, kx, kh, kc, kp = jax.random.split(key, 5)
    x = jax.random.normal(kx, (B, input_size), jnp.float32)
    hidden = jax.random.normal(kh, (num_layers, B, hidden_size), jnp.float32)
    cell = jax.random.normal(kc, (num_layers, B, hidden_size), jnp.float32)

    raw_params = init_params(kp, input_size, hidden_size, num_layers)
    # bf16 weight storage (f32 accumulation) per the bandwidth-bound analysis.
    params = prepare_params(raw_params, hidden_size, param_dtype=jnp.bfloat16)

    fwd = jax.jit(multi_layer_lstm_cell)
    h_out, c_out = fwd(x, hidden, cell, params)
    h_out = jax.block_until_ready(h_out)
    c_out = jax.block_until_ready(c_out)

    h_ref, c_ref = _reference(x, hidden, cell, raw_params)
    assert h_out.shape == (num_layers, B, hidden_size)
    assert c_out.shape == (num_layers, B, hidden_size)
    # Tolerance loosened vs. pure-f32 because weights/activation dots are bf16.
    assert jnp.allclose(h_out, h_ref, atol=3e-2, rtol=3e-2)
    assert jnp.allclose(c_out, c_ref, atol=3e-2, rtol=3e-2)

    print("KERNEL_OK")
</pallas_src>

<mosaic_0001>
module attributes {stable_mosaic.version = 11 : i64} {
  func.func @_fused_multilayer_lstm_kernel(%arg0: memref<8x16xf32, #tpu.memory_space<vmem>>, %arg1: memref<2x8x128xf32, #tpu.memory_space<vmem>>, %arg2: memref<2x8x128xf32, #tpu.memory_space<vmem>>, %arg3: memref<16x512xbf16, #tpu.memory_space<vmem>>, %arg4: memref<128x512xbf16, #tpu.memory_space<vmem>>, %arg5: memref<1x512xf32, #tpu.memory_space<vmem>>, %arg6: memref<128x512xbf16, #tpu.memory_space<vmem>>, %arg7: memref<128x512xbf16, #tpu.memory_space<vmem>>, %arg8: memref<1x512xf32, #tpu.memory_space<vmem>>, %arg9: memref<2x8x128xf32, #tpu.memory_space<vmem>>, %arg10: memref<2x8x128xf32, #tpu.memory_space<vmem>>) attributes {dimension_semantics = [], scalar_prefetch = 0 : i64, scratch_operands = 0 : i64, tpu.core_type = #tpu.core_type<tc>} {
    %c0 = arith.constant 0 : index
    %c0_0 = arith.constant 0 : index
    %0 = vector.load %arg0[%c0, %c0_0] : memref<8x16xf32, #tpu.memory_space<vmem>>, vector<8x16xf32>
    %c0_1 = arith.constant 0 : index
    %c0_2 = arith.constant 0 : index
    %1 = vector.load %arg3[%c0_1, %c0_2] : memref<16x512xbf16, #tpu.memory_space<vmem>>, vector<16x512xbf16>
    %c0_3 = arith.constant 0 : index
    %c0_4 = arith.constant 0 : index
    %2 = vector.load %arg4[%c0_3, %c0_4] : memref<128x512xbf16, #tpu.memory_space<vmem>>, vector<128x512xbf16>
    %c0_5 = arith.constant 0 : index
    %c0_6 = arith.constant 0 : index
    %3 = vector.load %arg5[%c0_5, %c0_6] : memref<1x512xf32, #tpu.memory_space<vmem>>, vector<1x512xf32>
    %c0_7 = arith.constant 0 : index
    %c0_8 = arith.constant 0 : index
    %c0_9 = arith.constant 0 : index
    %4 = vector.load %arg1[%c0_7, %c0_8, %c0_9] : memref<2x8x128xf32, #tpu.memory_space<vmem>>, vector<1x8x128xf32>
    %5 = vector.shape_cast %4 : vector<1x8x128xf32> to vector<8x128xf32>
    %c0_10 = arith.constant 0 : index
    %c0_11 = arith.constant 0 : index
    %c0_12 = arith.constant 0 : index
    %6 = vector.load %arg2[%c0_10, %c0_11, %c0_12] : memref<2x8x128xf32, #tpu.memory_space<vmem>>, vector<1x8x128xf32>
    %7 = vector.shape_cast %6 : vector<1x8x128xf32> to vector<8x128xf32>
    %8 = arith.truncf %0 : vector<8x16xf32> to vector<8x16xbf16>
    %cst = arith.constant dense<0.000000e+00> : vector<8x512xf32>
    %9 = tpu.matmul %8, %1, %cst {dimension_numbers = #tpu.dot_dimension_numbers<[1], [0], [0], [1], [0, 0, 1, 1], [], []>} : vector<8x16xbf16>, vector<16x512xbf16>, vector<8x512xf32> -> vector<8x512xf32>
    %10 = arith.truncf %5 : vector<8x128xf32> to vector<8x128xbf16>
    %cst_13 = arith.constant dense<0.000000e+00> : vector<8x512xf32>
    %11 = tpu.matmul %10, %2, %cst_13 {dimension_numbers = #tpu.dot_dimension_numbers<[1], [0], [0], [1], [0, 0, 1, 1], [], []>} : vector<8x128xbf16>, vector<128x512xbf16>, vector<8x512xf32> -> vector<8x512xf32>
    %12 = arith.addf %9, %11 : vector<8x512xf32>
    %13 = vector.broadcast %3 : vector<1x512xf32> to vector<8x512xf32>
    %14 = arith.addf %12, %13 : vector<8x512xf32>
    %15 = vector.extract_strided_slice %14 {offsets = [0, 0], sizes = [8, 384], strides = [1, 1]} : vector<8x512xf32> to vector<8x384xf32>
    %16 = arith.negf %15 : vector<8x384xf32>
    %17 = math.exp %16 : vector<8x384xf32>
    %cst_14 = arith.constant 1.000000e+00 : f32
    %18 = vector.broadcast %cst_14 : f32 to vector<8x384xf32>
    %19 = arith.addf %18, %17 : vector<8x384xf32>
    %20 = arith.divf %18, %19 : vector<8x384xf32>
    %21 = vector.extract_strided_slice %20 {offsets = [0, 0], sizes = [8, 128], strides = [1, 1]} : vector<8x384xf32> to vector<8x128xf32>
    %22 = vector.extract_strided_slice %20 {offsets = [0, 128], sizes = [8, 128], strides = [1, 1]} : vector<8x384xf32> to vector<8x128xf32>
    %23 = vector.extract_strided_slice %20 {offsets = [0, 256], sizes = [8, 128], strides = [1, 1]} : vector<8x384xf32> to vector<8x128xf32>
    %24 = vector.extract_strided_slice %14 {offsets = [0, 384], sizes = [8, 128], strides = [1, 1]} : vector<8x512xf32> to vector<8x128xf32>
    %25 = math.tanh %24 : vector<8x128xf32>
    %26 = arith.mulf %22, %7 : vector<8x128xf32>
    %27 = arith.mulf %21, %25 : vector<8x128xf32>
    %28 = arith.addf %26, %27 : vector<8x128xf32>
    %29 = math.tanh %28 : vector<8x128xf32>
    %30 = arith.mulf %23, %29 : vector<8x128xf32>
    %c0_15 = arith.constant 0 : index
    %c0_16 = arith.constant 0 : index
    %c0_17 = arith.constant 0 : index
    %31 = vector.load %arg9[%c0_15, %c0_16, %c0_17] : memref<2x8x128xf32, #tpu.memory_space<vmem>>, vector<1x8x128xf32>
    %32 = vector.shape_cast %31 : vector<1x8x128xf32> to vector<8x128xf32>
    %33 = vector.shape_cast %30 : vector<8x128xf32> to vector<1x8x128xf32>
    tpu.vector_store %arg9[%c0_15, %c0_16, %c0_17], %33 {strides = array<i32>} : memref<2x8x128xf32, #tpu.memory_space<vmem>>, vector<1x8x128xf32>,
    %c0_18 = arith.constant 0 : index
    %c0_19 = arith.constant 0 : index
    %c0_20 = arith.constant 0 : index
    %34 = vector.load %arg10[%c0_18, %c0_19, %c0_20] : memref<2x8x128xf32, #tpu.memory_space<vmem>>, vector<1x8x128xf32>
    %35 = vector.shape_cast %34 : vector<1x8x128xf32> to vector<8x128xf32>
    %36 = vector.shape_cast %28 : vector<8x128xf32> to vector<1x8x128xf32>
    tpu.vector_store %arg10[%c0_18, %c0_19, %c0_20], %36 {strides = array<i32>} : memref<2x8x128xf32, #tpu.memory_space<vmem>>, vector<1x8x128xf32>,
    %c0_21 = arith.constant 0 : index
    %c0_22 = arith.constant 0 : index
    %37 = vector.load %arg6[%c0_21, %c0_22] : memref<128x512xbf16, #tpu.memory_space<vmem>>, vector<128x512xbf16>
    %c0_23 = arith.constant 0 : index
    %c0_24 = arith.constant 0 : index
    %38 = vector.load %arg7[%c0_23, %c0_24] : memref<128x512xbf16, #tpu.memory_space<vmem>>, vector<128x512xbf16>
    %c0_25 = arith.constant 0 : index
    %c0_26 = arith.constant 0 : index
    %39 = vector.load %arg8[%c0_25, %c0_26] : memref<1x512xf32, #tpu.memory_space<vmem>>, vector<1x512xf32>
    %c1 = arith.constant 1 : index
    %c0_27 = arith.constant 0 : index
    %c0_28 = arith.constant 0 : index
    %40 = vector.load %arg1[%c1, %c0_27, %c0_28] : memref<2x8x128xf32, #tpu.memory_space<vmem>>, vector<1x8x128xf32>
    %41 = vector.shape_cast %40 : vector<1x8x128xf32> to vector<8x128xf32>
    %c1_29 = arith.constant 1 : index
    %c0_30 = arith.constant 0 : index
    %c0_31 = arith.constant 0 : index
    %42 = vector.load %arg2[%c1_29, %c0_30, %c0_31] : memref<2x8x128xf32, #tpu.memory_space<vmem>>, vector<1x8x128xf32>
    %43 = vector.shape_cast %42 : vector<1x8x128xf32> to vector<8x128xf32>
    %44 = arith.truncf %30 : vector<8x128xf32> to vector<8x128xbf16>
    %cst_32 = arith.constant dense<0.000000e+00> : vector<8x512xf32>
    %45 = tpu.matmul %44, %37, %cst_32 {dimension_numbers = #tpu.dot_dimension_numbers<[1], [0], [0], [1], [0, 0, 1, 1], [], []>} : vector<8x128xbf16>, vector<128x512xbf16>, vector<8x512xf32> -> vector<8x512xf32>
    %46 = arith.truncf %41 : vector<8x128xf32> to vector<8x128xbf16>
    %cst_33 = arith.constant dense<0.000000e+00> : vector<8x512xf32>
    %47 = tpu.matmul %46, %38, %cst_33 {dimension_numbers = #tpu.dot_dimension_numbers<[1], [0], [0], [1], [0, 0, 1, 1], [], []>} : vector<8x128xbf16>, vector<128x512xbf16>, vector<8x512xf32> -> vector<8x512xf32>
    %48 = arith.addf %45, %47 : vector<8x512xf32>
    %49 = vector.broadcast %39 : vector<1x512xf32> to vector<8x512xf32>
    %50 = arith.addf %48, %49 : vector<8x512xf32>
    %51 = vector.extract_strided_slice %50 {offsets = [0, 0], sizes = [8, 384], strides = [1, 1]} : vector<8x512xf32> to vector<8x384xf32>
    %52 = arith.negf %51 : vector<8x384xf32>
    %53 = math.exp %52 : vector<8x384xf32>
    %cst_34 = arith.constant 1.000000e+00 : f32
    %54 = vector.broadcast %cst_34 : f32 to vector<8x384xf32>
    %55 = arith.addf %54, %53 : vector<8x384xf32>
    %56 = arith.divf %54, %55 : vector<8x384xf32>
    %57 = vector.extract_strided_slice %56 {offsets = [0, 0], sizes = [8, 128], strides = [1, 1]} : vector<8x384xf32> to vector<8x128xf32>
    %58 = vector.extract_strided_slice %56 {offsets = [0, 128], sizes = [8, 128], strides = [1, 1]} : vector<8x384xf32> to vector<8x128xf32>
    %59 = vector.extract_strided_slice %56 {offsets = [0, 256], sizes = [8, 128], strides = [1, 1]} : vector<8x384xf32> to vector<8x128xf32>
    %60 = vector.extract_strided_slice %50 {offsets = [0, 384], sizes = [8, 128], strides = [1, 1]} : vector<8x512xf32> to vector<8x128xf32>
    %61 = math.tanh %60 : vector<8x128xf32>
    %62 = arith.mulf %58, %43 : vector<8x128xf32>
    %63 = arith.mulf %57, %61 : vector<8x128xf32>
    %64 = arith.addf %62, %63 : vector<8x128xf32>
    %65 = math.tanh %64 : vector<8x128xf32>
    %66 = arith.mulf %59, %65 : vector<8x128xf32>
    %c1_35 = arith.constant 1 : index
    %c0_36 = arith.constant 0 : index
    %c0_37 = arith.constant 0 : index
    %67 = vector.load %arg9[%c1_35, %c0_36, %c0_37] : memref<2x8x128xf32, #tpu.memory_space<vmem>>, vector<1x8x128xf32>
    %68 = vector.shape_cast %67 : vector<1x8x128xf32> to vector<8x128xf32>
    %69 = vector.shape_cast %66 : vector<8x128xf32> to vector<1x8x128xf32>
    tpu.vector_store %arg9[%c1_35, %c0_36, %c0_37], %69 {strides = array<i32>} : memref<2x8x128xf32, #tpu.memory_space<vmem>>, vector<1x8x128xf32>,
    %c1_38 = arith.constant 1 : index
    %c0_39 = arith.constant 0 : index
    %c0_40 = arith.constant 0 : index
    %70 = vector.load %arg10[%c1_38, %c0_39, %c0_40] : memref<2x8x128xf32, #tpu.memory_space<vmem>>, vector<1x8x128xf32>
    %71 = vector.shape_cast %70 : vector<1x8x128xf32> to vector<8x128xf32>
    %72 = vector.shape_cast %64 : vector<8x128xf32> to vector<1x8x128xf32>
    tpu.vector_store %arg10[%c1_38, %c0_39, %c0_40], %72 {strides = array<i32>} : memref<2x8x128xf32, #tpu.memory_space<vmem>>, vector<1x8x128xf32>,
    return
  }
}

</mosaic_0001>

<bundles_post_ra>
// kernel: multi_layer_lstm_cell.1
= control target key start
LH: loop header
LB: loop body
LE: loop exit
PB: predicated region body
PF: predicated region fallthrough
CT: control target
= control target key end

     0   :  { %16 = vsyncpa [#allocation3], 0  ;;  %s1928_s0 = inlined_call_operand.vmem [shape: f32[8,16], index: 0, kind: input, shape index: {}]   ;;  %s1929_s1 = inlined_call_operand.vmem [shape: f32[2,8,128], index: 1, kind: input, shape index: {}]   ;;  %s1930_s2 = inlined_call_operand.vmem [shape: f32[2,8,128], index: 2, kind: input, shape index: {}]   ;;  %s1931_s3 = inlined_call_operand.vmem [shape: bf16[16,512], index: 3, kind: input, shape index: {}]   ;;  %s1932_s4 = inlined_call_operand.hbm [shape: bf16[128,512], index: 4, kind: input, shape index: {}]   ;;  %s1933_s5 = inlined_call_operand.vmem [shape: f32[1,512], index: 5, kind: input, shape index: {}]   ;;  %s1934_s6 = inlined_call_operand.hbm [shape: bf16[128,512], index: 6, kind: input, shape index: {}]   ;;  %s1935_s7 = inlined_call_operand.hbm [shape: bf16[128,512], index: 7, kind: input, shape index: {}]   ;;  %s1936_s8 = inlined_call_operand.vmem [shape: f32[1,512], index: 8, kind: input, shape index: {}]   ;;  %s1937_s9 = inlined_call_operand.hbm [shape: f32[2,8,128], index: 9, kind: output, shape index: {0}]   ;;  %s1938_s10 = inlined_call_operand.hbm [shape: f32[2,8,128], index: 10, kind: output, shape index: {1}]  }
   0x1   :  { %17 = vsyncpa [#allocation6], 0 }
   0x2   :  { %18 = vsyncpa [#allocation4], 0 }
   0x3   :  { %19 = vsyncpa [#allocation10], 0  ;;  %s47_s15 = sshll.u32 %s1934_s6, 4  ;;  %s1786_s16 = smov [#allocation5]   ;;  %s48_s15 = int_to_ptr.hbm [resolvable:$true] %s47_s15 }
   0x4   :  { %s49_s17 = sshll.u32 %s1786_s16, 4  ;;  %s32_s20 = sshll.u32 %s1932_s4, 4  ;;  %s50_s17 = int_to_ptr.vmem [resolvable:$true] %s49_s17  ;;  %s33_s20 = int_to_ptr.hbm [resolvable:$true] %s32_s20 }
   0x5   :  { %s1787_s21 = smov 256   ;;  %s1788_s22 = smov 16  }
   0x6   :  { %55 = dma.hbm_to_vmem [thread:$0]  %s48_s15, 4096, %s50_s17, [#allocation6], %s1787_s21, %s1787_s21, %s1788_s22  }
   0x7   :  { %s1789_s23 = smov [#allocation2]   ;;  %s60_s27 = sshll.u32 %s1935_s7, 4  ;;  %s61_s27 = int_to_ptr.hbm [resolvable:$true] %s60_s27 }
   0x8   :  { %s34_s24 = sshll.u32 %s1789_s23, 4  ;;  %s1790_s6 = smov [#allocation7]   ;;  %s35_s24 = int_to_ptr.vmem [resolvable:$true] %s34_s24 }
   0x9   :  { %40 = dma.hbm_to_vmem [thread:$0]  %s33_s20, 4096, %s35_s24, [#allocation3], %s1787_s21, %s1787_s21, %s1788_s22  }
   0xa   :  { %s62_s28 = sshll.u32 %s1790_s6, 4  ;;  %s63_s28 = int_to_ptr.vmem [resolvable:$true] %s62_s28 }
   0xb   :  { %68 = dma.hbm_to_vmem [thread:$0]  %s61_s27, 4096, %s63_s28, [#allocation6], %s1787_s21, %s1787_s21, %s1788_s22  }
   0xc   :  { %1778 = dma.done.wait [#allocation3], 4096  }
   0xd   :  { %1779 = vsyncadd [#allocation3], 4294963200 }
   0xe   :  { %1780 = dma.done.wait [#allocation6], 8192  }
   0xf   :  { %1781 = vsyncadd [#allocation6], 4294959104  ;;  %v1219_v0 = vld [vmem:[#allocation2 + $0xe0] sm:$0xf]  ;;  %v1551_v1 = vld [vmem:[#allocation2 + $0xec] sm:$0xf0] }
  0x10   :  { %v1549_v2 = vld [vmem:[#allocation2 + $0xe4] sm:$0xf]  ;;  %v1220_v3 = vor.u32 %v1551_v1, %v1219_v0  ;;  %v1221_v4 = vld [vmem:[#allocation2 + $0xf0] sm:$0xf0]  ;;  %v1227_v5 = vld [vmem:[#allocation2 + $0xe8] sm:$0xf] }
  0x11   :  { %v1552_v6 = vld [vmem:[#allocation2 + $0xf4] sm:$0xf0]  ;;  %v1224_v7 = vor.u32 %v1549_v2, %v1221_v4  ;;  %v1550_v9 = vld [vmem:[#allocation2 + $0xec] sm:$0xf]  ;;  %v1229_v10 = vld [vmem:[#allocation2 + $0xf8] sm:$0xf0] }
  0x12   :  { %v1228_v8 = vor.u32 %v1552_v6, %v1227_v5  ;;  %v1203_v11 = vld [vmem:[#allocation2 + $0xc0] sm:$0xf]  ;;  %286 = vmatpush.bf16.msra.mxu0 %v1220_v3  ;;  %v1232_v12 = vor.u32 %v1550_v9, %v1229_v10  ;;  %v1547_v13 = vld [vmem:[#allocation2 + $0xcc] sm:$0xf0]  ;;  %v1545_v14 = vld [vmem:[#allocation2 + $0xc4] sm:$0xf] }
  0x13   :  { %v1205_v15 = vld [vmem:[#allocation2 + $0xd0] sm:$0xf0]  ;;  %299 = vmatpush.bf16.msra.mxu1 %v1224_v7  ;;  %v1204_v16 = vor.u32 %v1547_v13, %v1203_v11  ;;  %v1211_v18 = vld [vmem:[#allocation2 + $0xc8] sm:$0xf]  ;;  %v1548_v19 = vld [vmem:[#allocation2 + $0xd4] sm:$0xf0] }
  0x14   :  { %312 = vmatpush.bf16.msra.mxu2 %v1228_v8  ;;  %v1208_v17 = vor.u32 %v1545_v14, %v1205_v15  ;;  %v1546_v20 = vld [vmem:[#allocation2 + $0xcc] sm:$0xf]  ;;  %325 = vmatpush.bf16.msra.mxu3 %v1232_v12  ;;  %v1212_v21 = vor.u32 %v1548_v19, %v1211_v18  ;;  %v1213_v22 = vld [vmem:[#allocation2 + $0xd8] sm:$0xf0]  ;;  %v1187_v23 = vld [vmem:[#allocation2 + $0xa0] sm:$0xf] }
  0x15   :  { %v1543_v24 = vld [vmem:[#allocation2 + $0xac] sm:$0xf0]  ;;  %v1216_v25 = vor.u32 %v1546_v20, %v1213_v22  ;;  %v1541_v26 = vld [vmem:[#allocation2 + $0xa4] sm:$0xf]  ;;  %v1189_v27 = vld [vmem:[#allocation2 + $0xb0] sm:$0xf0] }
  0x16   :  { %v1195_v28 = vld [vmem:[#allocation2 + $0xa8] sm:$0xf]  ;;  %287 = vmatpush.bf16.msra.mxu0 %v1204_v16  ;;  %v1188_v29 = vor.u32 %v1543_v24, %v1187_v23  ;;  %v1544_v30 = vld [vmem:[#allocation2 + $0xb4] sm:$0xf0]  ;;  %v1542_v31 = vld [vmem:[#allocation2 + $0xac] sm:$0xf]  ;;  %v1192_v33 = vor.u32 %v1541_v26, %v1189_v27 }
  0x17   :  { %v1197_v32 = vld [vmem:[#allocation2 + $0xb8] sm:$0xf0]  ;;  %300 = vmatpush.bf16.msra.mxu1 %v1208_v17  ;;  %v1196_v34 = vor.u32 %v1544_v30, %v1195_v28  ;;  %v1171_v35 = vld [vmem:[#allocation2 + $0x80] sm:$0xf]  ;;  %v1539_v36 = vld [vmem:[#allocation2 + $0x8c] sm:$0xf0] }
  0x18   :  { %313 = vmatpush.bf16.msra.mxu2 %v1212_v21  ;;  %v1537_v37 = vld [vmem:[#allocation2 + $0x84] sm:$0xf]  ;;  %326 = vmatpush.bf16.msra.mxu3 %v1216_v25  ;;  %v1200_v38 = vor.u32 %v1542_v31, %v1197_v32  ;;  %v1173_v39 = vld [vmem:[#allocation2 + $0x90] sm:$0xf0]  ;;  %v1179_v40 = vld [vmem:[#allocation2 + $0x88] sm:$0xf]  ;;  %v1172_v44 = vor.u32 %v1539_v36, %v1171_v35 }
  0x19   :  { %v1540_v41 = vld [vmem:[#allocation2 + $0x94] sm:$0xf0]  ;;  %v1538_v42 = vld [vmem:[#allocation2 + $0x8c] sm:$0xf]  ;;  %v1181_v43 = vld [vmem:[#allocation2 + $0x98] sm:$0xf0]  ;;  %v1176_v45 = vor.u32 %v1537_v37, %v1173_v39 }
  0x1a   :  { %288 = vmatpush.bf16.msra.mxu0 %v1188_v29  ;;  %v1180_v46 = vor.u32 %v1540_v41, %v1179_v40  ;;  %v1155_v47 = vld [vmem:[#allocation2 + $0x60] sm:$0xf]  ;;  %v1535_v48 = vld [vmem:[#allocation2 + $0x6c] sm:$0xf0]  ;;  %v1533_v49 = vld [vmem:[#allocation2 + $0x64] sm:$0xf]  ;;  %v1184_v50 = vor.u32 %v1538_v42, %v1181_v43 }
  0x1b   :  { %301 = vmatpush.bf16.msra.mxu1 %v1192_v33  ;;  %v1157_v51 = vld [vmem:[#allocation2 + $0x70] sm:$0xf0]  ;;  %v1163_v52 = vld [vmem:[#allocation2 + $0x68] sm:$0xf]  ;;  %v1536_v53 = vld [vmem:[#allocation2 + $0x74] sm:$0xf0]  ;;  %v1156_v56 = vor.u32 %v1535_v48, %v1155_v47 }
  0x1c   :  { %314 = vmatpush.bf16.msra.mxu2 %v1196_v34  ;;  %327 = vmatpush.bf16.msra.mxu3 %v1200_v38  ;;  %v1534_v54 = vld [vmem:[#allocation2 + $0x6c] sm:$0xf]  ;;  %v1165_v55 = vld [vmem:[#allocation2 + $0x78] sm:$0xf0]  ;;  %v1160_v57 = vor.u32 %v1533_v49, %v1157_v51  ;;  %v1164_v58 = vor.u32 %v1536_v53, %v1163_v52  ;;  %v1139_v59 = vld [vmem:[#allocation2 + $0x40] sm:$0xf] }
  0x1d   :  { %v1531_v60 = vld [vmem:[#allocation2 + $0x4c] sm:$0xf0]  ;;  %v1529_v61 = vld [vmem:[#allocation2 + $0x44] sm:$0xf]  ;;  %v1168_v62 = vor.u32 %v1534_v54, %v1165_v55  ;;  %v1141_v63 = vld [vmem:[#allocation2 + $0x50] sm:$0xf0] }
  0x1e   :  { %289 = vmatpush.bf16.msra.mxu0 %v1172_v44  ;;  %v1147_v0 = vld [vmem:[#allocation2 + $0x48] sm:$0xf]  ;;  %v1532_v1 = vld [vmem:[#allocation2 + $0x54] sm:$0xf0]  ;;  %v1530_v2 = vld [vmem:[#allocation2 + $0x4c] sm:$0xf]  ;;  %v1140_v4 = vor.u32 %v1531_v60, %v1139_v59  ;;  %v1144_v5 = vor.u32 %v1529_v61, %v1141_v63 }
  0x1f   :  { %302 = vmatpush.bf16.msra.mxu1 %v1176_v45  ;;  %v1149_v3 = vld [vmem:[#allocation2 + $0x58] sm:$0xf0]  ;;  %v1148_v6 = vor.u32 %v1532_v1, %v1147_v0  ;;  %v1123_v7 = vld [vmem:[#allocation2 + $0x20] sm:$0xf]  ;;  %v1527_v8 = vld [vmem:[#allocation2 + $0x2c] sm:$0xf0] }
  0x20   :  { %315 = vmatpush.bf16.msra.mxu2 %v1180_v46  ;;  %328 = vmatpush.bf16.msra.mxu3 %v1184_v50  ;;  %v1525_v9 = vld [vmem:[#allocation2 + $0x24] sm:$0xf]  ;;  %v1152_v10 = vor.u32 %v1530_v2, %v1149_v3  ;;  %v1125_v11 = vld [vmem:[#allocation2 + $0x30] sm:$0xf0]  ;;  %v1131_v12 = vld [vmem:[#allocation2 + $0x28] sm:$0xf]  ;;  %v1124_v16 = vor.u32 %v1527_v8, %v1123_v7 }
  0x21   :  { %v1528_v13 = vld [vmem:[#allocation2 + $0x34] sm:$0xf0]  ;;  %v1526_v14 = vld [vmem:[#allocation2 + $0x2c] sm:$0xf]  ;;  %v1133_v15 = vld [vmem:[#allocation2 + $0x38] sm:$0xf0]  ;;  %v1128_v18 = vor.u32 %v1525_v9, %v1125_v11 }
  0x22   :  { %290 = vmatpush.bf16.msra.mxu0 %v1156_v56  ;;  %v1107_v17 = vld [vmem:[#allocation2] sm:$0xf]  ;;  %v1132_v19 = vor.u32 %v1528_v13, %v1131_v12  ;;  %v1523_v20 = vld [vmem:[#allocation2 + $0xc] sm:$0xf0]  ;;  %v1521_v21 = vld [vmem:[#allocation2 + $0x4] sm:$0xf]  ;;  %v1136_v23 = vor.u32 %v1526_v14, %v1133_v15 }
  0x23   :  { %303 = vmatpush.bf16.msra.mxu1 %v1160_v57  ;;  %v1109_v22 = vld [vmem:[#allocation2 + $0x10] sm:$0xf0]  ;;  %v1115_v24 = vld [vmem:[#allocation2 + $0x8] sm:$0xf]  ;;  %v1524_v25 = vld [vmem:[#allocation2 + $0x14] sm:$0xf0]  ;;  %v1108_v30 = vor.u32 %v1523_v20, %v1107_v17 }
  0x24   :  { %316 = vmatpush.bf16.msra.mxu2 %v1164_v58  ;;  %329 = vmatpush.bf16.msra.mxu3 %v1168_v62  ;;  %v1522_v26 = vld [vmem:[#allocation2 + $0xc] sm:$0xf]  ;;  %v1117_v27 = vld [vmem:[#allocation2 + $0x18] sm:$0xf0]  ;;  %v1235_v28 = vld [vmem:[%s1931_s3] sm:$0xf]  ;;  %v1112_v34 = vor.u32 %v1521_v21, %v1109_v22  ;;  %v1116_v35 = vor.u32 %v1524_v25, %v1115_v24 }
  0x25   :  { %v1519_v29 = vld [vmem:[%s1931_s3 + $0xc] sm:$0xf0]  ;;  %v122_v31 = vld [vmem:[%s1929_s1] sm:$0xff]  ;;  %v1237_v33 = vld [vmem:[%s1931_s3 + $0x10] sm:$0xf0]  ;;  %v1120_v36 = vor.u32 %v1522_v26, %v1117_v27  ;;  %vm358_vm0 = vcmask 130048  }
  0x26   :  { %291 = vmatpush.bf16.msra.mxu0 %v1140_v4  ;;  %v1517_v32 = vld [vmem:[%s1931_s3 + $0x4] sm:$0xf]  ;;  %v1236_v37 = vor.u32 %v1519_v29, %v1235_v28  ;;  %v1243_v38 = vld [vmem:[%s1931_s3 + $0x8] sm:$0xf]  ;;  %v1520_v39 = vld [vmem:[%s1931_s3 + $0x14] sm:$0xf0]  ;;  %v125_v40 = vpack.c.bf16 %v122_v31, %v122_v31 }
  0x27   :  { %304 = vmatpush.bf16.msra.mxu1 %v1144_v5  ;;  %v1240_v41 = vor.u32 %v1517_v32, %v1237_v33  ;;  %v1518_v42 = vld [vmem:[%s1931_s3 + $0xc] sm:$0xf]  ;;  %v1245_v43 = vld [vmem:[%s1931_s3 + $0x18] sm:$0xf0]  ;;  %v1244_v44 = vor.u32 %v1520_v39, %v1243_v38  ;;  %v84_v46 = vld [vmem:[%s1928_s0] sm:$0xff]  ;;  %s1791_s29 = smov [#allocation9]  }
  0x28   :  { %317 = vmatpush.bf16.msra.mxu2 %v1148_v6  ;;  %330 = vmatpush.bf16.msra.mxu3 %v1152_v10  ;;  %v1248_v45 = vor.u32 %v1518_v42, %v1245_v43  ;;  %v124_v47 = vpack.c.bf16 %v84_v46, %v84_v46  ;;  %v1372_v48 = vld [vmem:[#allocation7 + $0xe0] sm:$0xf]  ;;  %v1615_v49 = vld [vmem:[#allocation7 + $0xec] sm:$0xf0]  ;;  %v1613_v50 = vld [vmem:[#allocation7 + $0xe4] sm:$0xf] }
  0x29   :  { %v1373_v51 = vor.u32 %v1615_v49, %v1372_v48  ;;  %v1374_v52 = vld [vmem:[#allocation7 + $0xf0] sm:$0xf0]  ;;  %v1380_v53 = vld [vmem:[#allocation7 + $0xe8] sm:$0xf]  ;;  %v1616_v54 = vld [vmem:[#allocation7 + $0xf4] sm:$0xf0] }
  0x2a   :  { %292 = vmatpush.bf16.msra.mxu0 %v1124_v16  ;;  %v1377_v55 = vor.u32 %v1613_v50, %v1374_v52  ;;  %v1381_v56 = vor.u32 %v1616_v54, %v1380_v53  ;;  %v1614_v57 = vld [vmem:[#allocation7 + $0xec] sm:$0xf]  ;;  %v1382_v58 = vld [vmem:[#allocation7 + $0xf8] sm:$0xf0]  ;;  %v1356_v60 = vld [vmem:[#allocation7 + $0xc0] sm:$0xf] }
  0x2b   :  { %305 = vmatpush.bf16.msra.mxu1 %v1128_v18  ;;  %v1385_v59 = vor.u32 %v1614_v57, %v1382_v58  ;;  %v1611_v61 = vld [vmem:[#allocation7 + $0xcc] sm:$0xf0]  ;;  %v1609_v62 = vld [vmem:[#allocation7 + $0xc4] sm:$0xf]  ;;  %v1358_v0 = vld [vmem:[#allocation7 + $0xd0] sm:$0xf0] }
  0x2c   :  { %318 = vmatpush.bf16.msra.mxu2 %v1132_v19  ;;  %331 = vmatpush.bf16.msra.mxu3 %v1136_v23  ;;  %v1357_v63 = vor.u32 %v1611_v61, %v1356_v60  ;;  %v1364_v1 = vld [vmem:[#allocation7 + $0xc8] sm:$0xf]  ;;  %v1612_v2 = vld [vmem:[#allocation7 + $0xd4] sm:$0xf0]  ;;  %v1361_v3 = vor.u32 %v1609_v62, %v1358_v0  ;;  %v1610_v5 = vld [vmem:[#allocation7 + $0xcc] sm:$0xf] }
  0x2d   :  { %v1365_v4 = vor.u32 %v1612_v2, %v1364_v1  ;;  %v1366_v6 = vld [vmem:[#allocation7 + $0xd8] sm:$0xf0]  ;;  %v1340_v7 = vld [vmem:[#allocation7 + $0xa0] sm:$0xf]  ;;  %v1607_v9 = vld [vmem:[#allocation7 + $0xac] sm:$0xf0] }
  0x2e   :  { %293 = vmatpush.bf16.msra.mxu0 %v1108_v30  ;;  %v1369_v8 = vor.u32 %v1610_v5, %v1366_v6  ;;  %v1605_v10 = vld [vmem:[#allocation7 + $0xa4] sm:$0xf]  ;;  %v1342_v11 = vld [vmem:[#allocation7 + $0xb0] sm:$0xf0]  ;;  %v1341_v12 = vor.u32 %v1607_v9, %v1340_v7  ;;  %v1348_v14 = vld [vmem:[#allocation7 + $0xa8] sm:$0xf] }
  0x2f   :  { %306 = vmatpush.bf16.msra.mxu1 %v1112_v34  ;;  %v1345_v13 = vor.u32 %v1605_v10, %v1342_v11  ;;  %v1608_v15 = vld [vmem:[#allocation7 + $0xb4] sm:$0xf0]  ;;  %v1606_v16 = vld [vmem:[#allocation7 + $0xac] sm:$0xf]  ;;  %v1350_v18 = vld [vmem:[#allocation7 + $0xb8] sm:$0xf0] }
  0x30   :  { %319 = vmatpush.bf16.msra.mxu2 %v1116_v35  ;;  %332 = vmatpush.bf16.msra.mxu3 %v1120_v36  ;;  %v1349_v17 = vor.u32 %v1608_v15, %v1348_v14  ;;  %v1353_v19 = vor.u32 %v1606_v16, %v1350_v18  ;;  %v1324_v20 = vld [vmem:[#allocation7 + $0x80] sm:$0xf]  ;;  %v1603_v21 = vld [vmem:[#allocation7 + $0x8c] sm:$0xf0]  ;;  %v1601_v22 = vld [vmem:[#allocation7 + $0x84] sm:$0xf] }
  0x31   :  { %294 = vmatmul.bf16.vlgmr.msra.gmra.mxu0 %v125_v40  ;;  %v1325_v23 = vor.u32 %v1603_v21, %v1324_v20  ;;  %v1326_v24 = vld [vmem:[#allocation7 + $0x90] sm:$0xf0]  ;;  %v1332_v25 = vld [vmem:[#allocation7 + $0x88] sm:$0xf]  ;;  %v1604_v27 = vld [vmem:[#allocation7 + $0x94] sm:$0xf0] }
  0x32   :  { %369 = vmatpush.bf16.msrb.mxu0 %v1236_v37  ;;  %307 = vmatmul.bf16.vlgmr.msra.gmra.mxu1 %v125_v40  ;;  %v1329_v26 = vor.u32 %v1601_v22, %v1326_v24  ;;  %v1602_v28 = vld [vmem:[#allocation7 + $0x8c] sm:$0xf]  ;;  %v1333_v29 = vor.u32 %v1604_v27, %v1332_v25  ;;  %v1334_v30 = vld [vmem:[#allocation7 + $0x98] sm:$0xf0]  ;;  %v1308_v32 = vld [vmem:[#allocation7 + $0x60] sm:$0xf] }
  0x33   :  { %382 = vmatpush.bf16.msrb.mxu1 %v1240_v41  ;;  %320 = vmatmul.bf16.vlgmr.msra.gmra.mxu2 %v125_v40  ;;  %v1337_v31 = vor.u32 %v1602_v28, %v1334_v30  ;;  %v1599_v33 = vld [vmem:[#allocation7 + $0x6c] sm:$0xf0]  ;;  %v1597_v35 = vld [vmem:[#allocation7 + $0x64] sm:$0xf]  ;;  %v1310_v36 = vld [vmem:[#allocation7 + $0x70] sm:$0xf0] }
  0x34   :  { %333 = vmatmul.bf16.vlgmr.msra.gmra.mxu3 %v125_v40  ;;  %395 = vmatpush.bf16.msrb.mxu2 %v1244_v44  ;;  %v1309_v34 = vor.u32 %v1599_v33, %v1308_v32  ;;  %v1316_v37 = vld [vmem:[#allocation7 + $0x68] sm:$0xf]  ;;  %v1313_v38 = vor.u32 %v1597_v35, %v1310_v36  ;;  %v1600_v39 = vld [vmem:[#allocation7 + $0x74] sm:$0xf0]  ;;  %v1598_v40 = vld [vmem:[#allocation7 + $0x6c] sm:$0xf] }
  0x35   :  { %408 = vmatpush.bf16.msrb.mxu3 %v1248_v45  ;;  %v1318_v41 = vld [vmem:[#allocation7 + $0x78] sm:$0xf0]  ;;  %v1317_v42 = vor.u32 %v1600_v39, %v1316_v37  ;;  %v1292_v44 = vld [vmem:[#allocation7 + $0x40] sm:$0xf]  ;;  %v1595_v45 = vld [vmem:[#allocation7 + $0x4c] sm:$0xf0] }
  0x36   :  { %723 = vmatpush.bf16.msra.mxu0 %v1373_v51  ;;  %v1321_v43 = vor.u32 %v1598_v40, %v1318_v41  ;;  %v1593_v46 = vld [vmem:[#allocation7 + $0x44] sm:$0xf]  ;;  %v1294_v48 = vld [vmem:[#allocation7 + $0x50] sm:$0xf0]  ;;  %v1300_v49 = vld [vmem:[#allocation7 + $0x48] sm:$0xf] }
  0x37   :  { %736 = vmatpush.bf16.msra.mxu1 %v1377_v55  ;;  %v1596_v50 = vld [vmem:[#allocation7 + $0x54] sm:$0xf0]  ;;  %v1297_v51 = vor.u32 %v1593_v46, %v1294_v48  ;;  %v1594_v53 = vld [vmem:[#allocation7 + $0x4c] sm:$0xf]  ;;  %v1302_v54 = vld [vmem:[#allocation7 + $0x58] sm:$0xf0] }
  0x38   :  { %749 = vmatpush.bf16.msra.mxu2 %v1381_v56  ;;  %v1301_v52 = vor.u32 %v1596_v50, %v1300_v49  ;;  %v1305_v55 = vor.u32 %v1594_v53, %v1302_v54  ;;  %v1276_v56 = vld [vmem:[#allocation7 + $0x20] sm:$0xf]  ;;  %v1591_v57 = vld [vmem:[#allocation7 + $0x2c] sm:$0xf0]  ;;  %v1589_v58 = vld [vmem:[#allocation7 + $0x24] sm:$0xf] }
  0x39   :  { %762 = vmatpush.bf16.msra.mxu3 %v1385_v59  ;;  %v1277_v59 = vor.u32 %v1591_v57, %v1276_v56  ;;  %v1278_v60 = vld [vmem:[#allocation7 + $0x30] sm:$0xf0]  ;;  %v1284_v61 = vld [vmem:[#allocation7 + $0x28] sm:$0xf]  ;;  %v1592_v62 = vld [vmem:[#allocation7 + $0x34] sm:$0xf0] }
  0x3a   :  { %724 = vmatpush.bf16.msra.mxu0 %v1357_v63  ;;  %v1281_v63 = vor.u32 %v1589_v58, %v1278_v60  ;;  %v1285_v0 = vor.u32 %v1592_v62, %v1284_v61  ;;  %v1590_v1 = vld [vmem:[#allocation7 + $0x2c] sm:$0xf]  ;;  %v1286_v2 = vld [vmem:[#allocation7 + $0x38] sm:$0xf0]  ;;  %v1587_v5 = vld [vmem:[#allocation7 + $0xc] sm:$0xf0] }
  0x3b   :  { %737 = vmatpush.bf16.msra.mxu1 %v1361_v3  ;;  %v1289_v3 = vor.u32 %v1590_v1, %v1286_v2  ;;  %v1585_v6 = vld [vmem:[#allocation7 + $0x4] sm:$0xf]  ;;  %v1262_v9 = vld [vmem:[#allocation7 + $0x10] sm:$0xf0]  ;;  %v1268_v10 = vld [vmem:[#allocation7 + $0x8] sm:$0xf] }
  0x3c   :  { %750 = vmatpush.bf16.msra.mxu2 %v1365_v4  ;;  %v1260_v4 = vld [vmem:[#allocation7] sm:$0xf]  ;;  %v1588_v11 = vld [vmem:[#allocation7 + $0x14] sm:$0xf0]  ;;  %v1586_v15 = vld [vmem:[#allocation7 + $0xc] sm:$0xf] }
  0x3d   :  { %763 = vmatpush.bf16.msra.mxu3 %v1369_v8  ;;  %v1261_v8 = vor.u32 %v1587_v5, %v1260_v4  ;;  %v1269_v14 = vor.u32 %v1588_v11, %v1268_v10  ;;  %v1270_v16 = vld [vmem:[#allocation7 + $0x18] sm:$0xf0]  ;;  %v1581_v20 = vld [vmem:[#allocation5 + $0xe4] sm:$0xf]  ;;  %v1502_v21 = vld [vmem:[#allocation5 + $0xf0] sm:$0xf0] }
  0x3e   :  { %725 = vmatpush.bf16.msra.mxu0 %v1341_v12  ;;  %v1273_v18 = vor.u32 %v1586_v15, %v1270_v16  ;;  %v1508_v24 = vld [vmem:[#allocation5 + $0xe8] sm:$0xf]  ;;  %v1584_v25 = vld [vmem:[#allocation5 + $0xf4] sm:$0xf0]  ;;  %v1510_v28 = vld [vmem:[#allocation5 + $0xf8] sm:$0xf0] }
  0x3f   :  { %738 = vmatpush.bf16.msra.mxu1 %v1345_v13  ;;  %v1265_v13 = vor.u32 %v1585_v6, %v1262_v9  ;;  %v1509_v27 = vor.u32 %v1584_v25, %v1508_v24  ;;  %v1579_v30 = vld [vmem:[#allocation5 + $0xcc] sm:$0xf0]  ;;  %v1577_v33 = vld [vmem:[#allocation5 + $0xc4] sm:$0xf]  ;;  %v1492_v35 = vld [vmem:[#allocation5 + $0xc8] sm:$0xf] }
  0x40   :  { %751 = vmatpush.bf16.msra.mxu2 %v1349_v17  ;;  %v1500_v17 = vld [vmem:[#allocation5 + $0xe0] sm:$0xf]  ;;  %v1580_v37 = vld [vmem:[#allocation5 + $0xd4] sm:$0xf0]  ;;  %v1494_v39 = vld [vmem:[#allocation5 + $0xd8] sm:$0xf0] }
  0x41   :  { %1249 = vmatmul.msk.bf16.vlgmr.msrb.gmra.mxu0 %vm358_vm0, %v124_v47  ;;  %764 = vmatpush.bf16.msra.mxu3 %v1353_v19  ;;  %v1583_v19 = vld [vmem:[#allocation5 + $0xec] sm:$0xf0]  ;;  %v1493_v41 = vor.u32 %v1580_v37, %v1492_v35  ;;  %v1573_v49 = vld [vmem:[#allocation5 + $0xa4] sm:$0xf]  ;;  %v1476_v53 = vld [vmem:[#allocation5 + $0xa8] sm:$0xf] }
  0x42   :  { %1250 = vmatmul.msk.bf16.vlgmr.msrb.gmra.mxu1 %vm358_vm0, %v124_v47  ;;  %726 = vmatpush.bf16.msra.mxu0 %v1325_v23  ;;  %v1501_v22 = vor.u32 %v1583_v19, %v1500_v17  ;;  %v1505_v23 = vor.u32 %v1581_v20, %v1502_v21  ;;  %v1575_v48 = vld [vmem:[#allocation5 + $0xac] sm:$0xf0]  ;;  %v1576_v54 = vld [vmem:[#allocation5 + $0xb4] sm:$0xf0]  ;;  %v1574_v57 = vld [vmem:[#allocation5 + $0xac] sm:$0xf] }
  0x43   :  { %1251 = vmatmul.msk.bf16.vlgmr.msrb.gmra.mxu2 %vm358_vm0, %v124_v47  ;;  %739 = vmatpush.bf16.msra.mxu1 %v1329_v26  ;;  %v1582_v26 = vld [vmem:[#allocation5 + $0xec] sm:$0xf]  ;;  %v1477_v56 = vor.u32 %v1576_v54, %v1476_v53  ;;  %v1478_v58 = vld [vmem:[#allocation5 + $0xb8] sm:$0xf0]  ;;  %v1452_v61 = vld [vmem:[#allocation5 + $0x80] sm:$0xf] }
  0x44   :  { %1252 = vmatmul.msk.bf16.vlgmr.msrb.gmra.mxu3 %vm358_vm0, %v124_v47  ;;  %752 = vmatpush.bf16.msra.mxu2 %v1333_v29  ;;  %v1293_v47 = vor.u32 %v1595_v45, %v1292_v44  ;;  %v1484_v29 = vld [vmem:[#allocation5 + $0xc0] sm:$0xf]  ;;  %v1481_v60 = vor.u32 %v1574_v57, %v1478_v58  ;;  %v1571_v62 = vld [vmem:[#allocation5 + $0x8c] sm:$0xf0]  ;;  %v1454_v1 = vld [vmem:[#allocation5 + $0x90] sm:$0xf0] }
  0x45   :  { %765 = vmatpush.bf16.msra.mxu3 %v1337_v31  ;;  %v1513_v31 = vor.u32 %v1582_v26, %v1510_v28  ;;  %v1485_v32 = vor.u32 %v1579_v30, %v1484_v29  ;;  %v1460_v2 = vld [vmem:[#allocation5 + $0x88] sm:$0xf]  ;;  %v1570_v6 = vld [vmem:[#allocation5 + $0x8c] sm:$0xf]  ;;  %v1436_v16 = vld [vmem:[#allocation5 + $0x60] sm:$0xf] }
  0x46   :  { %727 = vmatpush.bf16.msra.mxu0 %v1309_v34  ;;  %v1486_v34 = vld [vmem:[#allocation5 + $0xd0] sm:$0xf0]  ;;  %v1567_v17 = vld [vmem:[#allocation5 + $0x6c] sm:$0xf0]  ;;  %v1565_v21 = vld [vmem:[#allocation5 + $0x64] sm:$0xf] }
  0x47   :  { %740 = vmatpush.bf16.msra.mxu1 %v1313_v38  ;;  %v1489_v36 = vor.u32 %v1577_v33, %v1486_v34  ;;  %v1578_v38 = vld [vmem:[#allocation5 + $0xcc] sm:$0xf]  ;;  %v1437_v20 = vor.u32 %v1567_v17, %v1436_v16  ;;  %v1568_v26 = vld [vmem:[#allocation5 + $0x74] sm:$0xf0]  ;;  %v1446_v28 = vld [vmem:[#allocation5 + $0x78] sm:$0xf0] }
  0x48   :  { %753 = vmatpush.bf16.msra.mxu2 %v1317_v42  ;;  %v1497_v42 = vor.u32 %v1578_v38, %v1494_v39  ;;  %v1420_v33 = vld [vmem:[#allocation5 + $0x40] sm:$0xf]  ;;  %v1563_v34 = vld [vmem:[#allocation5 + $0x4c] sm:$0xf0]  ;;  %v1561_v35 = vld [vmem:[#allocation5 + $0x44] sm:$0xf] }
  0x49   :  { %766 = vmatpush.bf16.msra.mxu3 %v1321_v43  ;;  %v1256_v43 = vld [vmem:[%s1929_s1 + $0x8] sm:$0xff]  ;;  %v1421_v37 = vor.u32 %v1563_v34, %v1420_v33  ;;  %v1557_v54 = vld [vmem:[#allocation5 + $0x24] sm:$0xf]  ;;  %s1084_s30 = sshll.u32 %s1791_s29, 4  ;;  %s1086_s13 = sshll.u32 %s1938_s10, 4  ;;  %s1085_s30 = int_to_ptr.vmem [resolvable:$true] %s1084_s30  ;;  %s1087_s13 = int_to_ptr.hbm [resolvable:$true] %s1086_s13 }
  0x4a   :  { %728 = vmatpush.bf16.msra.mxu0 %v1293_v47  ;;  %v562_v46 = vpack.c.bf16 %v1256_v43, %v1256_v43  ;;  %v1468_v47 = vld [vmem:[#allocation5 + $0xa0] sm:$0xf]  ;;  %v1428_v38 = vld [vmem:[#allocation5 + $0x48] sm:$0xf]  ;;  %v1562_v43 = vld [vmem:[#allocation5 + $0x4c] sm:$0xf] }
  0x4b   :  { %741 = vmatpush.bf16.msra.mxu1 %v1297_v51  ;;  %v1469_v51 = vor.u32 %v1575_v48, %v1468_v47  ;;  %v1430_v47 = vld [vmem:[#allocation5 + $0x58] sm:$0xf0]  ;;  %v1404_v48 = vld [vmem:[#allocation5 + $0x20] sm:$0xf]  ;;  %s1793_s14 = smov 8   ;;  %s1794_s15 = smov [#allocation8]  }
  0x4c   :  { %754 = vmatpush.bf16.msra.mxu2 %v1301_v52  ;;  %v1470_v52 = vld [vmem:[#allocation5 + $0xb0] sm:$0xf0]  ;;  %v1433_v53 = vor.u32 %v1562_v43, %v1430_v47  ;;  %v123_v43 = vld [vmem:[%s1930_s2] sm:$0xff]  ;;  %s1071_s10 = sshll.u32 %s1794_s15, 4  ;;  %s1073_s18 = sshll.u32 %s1937_s9, 4  ;;  %s1072_s10 = int_to_ptr.vmem [resolvable:$true] %s1071_s10  ;;  %s1074_s18 = int_to_ptr.hbm [resolvable:$true] %s1073_s18 }
  0x4d   :  { %767 = vmatpush.bf16.msra.mxu3 %v1305_v55  ;;  %v1473_v55 = vor.u32 %v1573_v49, %v1470_v52  ;;  %v1559_v49 = vld [vmem:[#allocation5 + $0x2c] sm:$0xf0] }
  0x4e   :  { %729 = vmatpush.bf16.msra.mxu0 %v1277_v59  ;;  %v1903_v59 = vld [vmem:[%s1933_s5] sm:$0xf]  ;;  %v1405_v58 = vor.u32 %v1559_v49, %v1404_v48 }
  0x4f   :  { %742 = vmatpush.bf16.msra.mxu1 %v1281_v63  ;;  %v1569_v63 = vld [vmem:[#allocation5 + $0x84] sm:$0xf]  ;;  %v415_v10 = vperm.slane %v1903_v59, 0  ;;  %v416_v15 = vperm.slane %v1903_v59, 1  ;;  %v417_v30 = vperm.slane %v1903_v59, 2 }
  0x50   :  { %755 = vmatpush.bf16.msra.mxu2 %v1285_v0  ;;  %v1453_v0 = vor.u32 %v1571_v62, %v1452_v61  ;;  %v1457_v4 = vor.u32 %v1569_v63, %v1454_v1  ;;  %v1558_v61 = vld [vmem:[#allocation5 + $0x2c] sm:$0xf]  ;;  %v1414_v62 = vld [vmem:[#allocation5 + $0x38] sm:$0xf0] }
  0x51   :  { %768 = vmatpush.bf16.msra.mxu3 %v1289_v3  ;;  %v1572_v3 = vld [vmem:[#allocation5 + $0x94] sm:$0xf0] }
  0x52   :  { %730 = vmatpush.bf16.msra.mxu0 %v1261_v8  ;;  %v1461_v5 = vor.u32 %v1572_v3, %v1460_v2  ;;  %v1462_v8 = vld [vmem:[#allocation5 + $0x98] sm:$0xf0]  ;;  %v1388_v2 = vld [vmem:[#allocation5] sm:$0xf]  ;;  %v1555_v3 = vld [vmem:[#allocation5 + $0xc] sm:$0xf0] }
  0x53   :  { %743 = vmatpush.bf16.msra.mxu1 %v1265_v13  ;;  %v1465_v11 = vor.u32 %v1570_v6, %v1462_v8  ;;  %v1396_v6 = vld [vmem:[#allocation5 + $0x8] sm:$0xf]  ;;  %v1556_v8 = vld [vmem:[#allocation5 + $0x14] sm:$0xf0] }
  0x54   :  { %756 = vmatpush.bf16.msra.mxu2 %v1269_v14 }
  0x55   :  { %769 = vmatpush.bf16.msra.mxu3 %v1273_v18  ;;  %731 = vmatmul.bf16.vlgmr.msra.gmra.mxu0 %v562_v46 }
  0x56   :  { %935 = vmatpush.bf16.msrb.mxu0 %v1501_v22  ;;  %744 = vmatmul.bf16.vlgmr.msra.gmra.mxu1 %v562_v46  ;;  %v1438_v22 = vld [vmem:[#allocation5 + $0x70] sm:$0xf0] }
  0x57   :  { %948 = vmatpush.bf16.msrb.mxu1 %v1505_v23  ;;  %757 = vmatmul.bf16.vlgmr.msra.gmra.mxu2 %v562_v46  ;;  %v1444_v23 = vld [vmem:[#allocation5 + $0x68] sm:$0xf]  ;;  %v1441_v25 = vor.u32 %v1565_v21, %v1438_v22 }
  0x58   :  { %961 = vmatpush.bf16.msrb.mxu2 %v1509_v27  ;;  %770 = vmatmul.bf16.vlgmr.msra.gmra.mxu3 %v562_v46  ;;  %v1566_v27 = vld [vmem:[#allocation5 + $0x6c] sm:$0xf] }
  0x59   :  { %974 = vmatpush.bf16.msrb.mxu3 %v1513_v31  ;;  %v1445_v31 = vor.u32 %v1568_v26, %v1444_v23 }
  0x5a   :  { %936 = vmatpush.bf16.msrb.mxu0 %v1485_v32 }
  0x5b   :  { %949 = vmatpush.bf16.msrb.mxu1 %v1489_v36 }
  0x5c   :  { %962 = vmatpush.bf16.msrb.mxu2 %v1493_v41 }
  0x5d   :  { %975 = vmatpush.bf16.msrb.mxu3 %v1497_v42  ;;  %v1564_v42 = vld [vmem:[#allocation5 + $0x54] sm:$0xf0] }
  0x5e   :  { %937 = vmatpush.bf16.msrb.mxu0 %v1469_v51  ;;  %v1429_v46 = vor.u32 %v1564_v42, %v1428_v38 }
  0x5f   :  { %950 = vmatpush.bf16.msrb.mxu1 %v1473_v55  ;;  %v1406_v55 = vld [vmem:[#allocation5 + $0x30] sm:$0xf0] }
  0x60   :  { %963 = vmatpush.bf16.msrb.mxu2 %v1477_v56  ;;  %v1412_v56 = vld [vmem:[#allocation5 + $0x28] sm:$0xf] }
  0x61   :  { %976 = vmatpush.bf16.msrb.mxu3 %v1481_v60  ;;  %v1560_v60 = vld [vmem:[#allocation5 + $0x34] sm:$0xf0] }
  0x62   :  { %938 = vmatpush.bf16.msrb.mxu0 %v1453_v0  ;;  %v1409_v0 = vor.u32 %v1557_v54, %v1406_v55  ;;  %v1413_v1 = vor.u32 %v1560_v60, %v1412_v56 }
  0x63   :  { %951 = vmatpush.bf16.msrb.mxu1 %v1457_v4  ;;  %v1417_v4 = vor.u32 %v1558_v61, %v1414_v62 }
  0x64   :  { %964 = vmatpush.bf16.msrb.mxu2 %v1461_v5  ;;  %v1390_v5 = vld [vmem:[#allocation5 + $0x10] sm:$0xf0] }
  0x65   :  { %977 = vmatpush.bf16.msrb.mxu3 %v1465_v11  ;;  %v1398_v11 = vld [vmem:[#allocation5 + $0x18] sm:$0xf0] }
  0x66   :  { %939 = vmatpush.bf16.msrb.mxu0 %v1437_v20 }
  0x67   :  { %952 = vmatpush.bf16.msrb.mxu1 %v1441_v25 }
  0x68   :  { %965 = vmatpush.bf16.msrb.mxu2 %v1445_v31 }
  0x6a   :  { %940 = vmatpush.bf16.msrb.mxu0 %v1421_v37 }
  0x6c   :  { %966 = vmatpush.bf16.msrb.mxu2 %v1429_v46 }
  0x6e   :  { %941 = vmatpush.bf16.msrb.mxu0 %v1405_v58 }
  0x70   :  { %967 = vmatpush.bf16.msrb.mxu2 %v1413_v1 }
  0xae   :  { %v1889_v7 = vpop.f32.mrf.mxu0 }
  0xaf   :  { %v1891_v12 = vpop.f32.mrf.mxu1 }
  0xb6   :  { %v1893_v40 = vpop.f32.mrf.mxu2  ;;  %v297_v45 = vpop.f32.mrf.mxu0 }
  0xb7   :  { %v1898_v44 = vpop.f32.mrf.mxu3  ;;  %v310_v50 = vpop.f32.mrf.mxu1 }
  0xbe   :  { %v323_v9 = vpop.f32.mrf.mxu2  ;;  %v371_v14 = vpop.f32.mrf.mxu0 }
  0xbf   :  { %v336_v13 = vpop.f32.mrf.mxu3  ;;  %v372_v18 = vadd.f32 %v371_v14, %v1889_v7  ;;  %v384_v19 = vpop.f32.mrf.mxu1  ;;  %v1449_v7 = vor.u32 %v1566_v27, %v1446_v28  ;;  %v1389_v14 = vor.u32 %v1555_v3, %v1388_v2 }
  0xc0   :  { %v385_v24 = vadd.f32 %v384_v19, %v1891_v12  ;;  %v1422_v12 = vld [vmem:[#allocation5 + $0x50] sm:$0xf0] }
  0xc1   :  { %v423_v29 = vadd.f32 %v415_v10, %v372_v18  ;;  %v1425_v41 = vor.u32 %v1561_v35, %v1422_v12  ;;  %978 = vmatpush.bf16.msrb.mxu3 %v1449_v7  ;;  %v1554_v10 = vld [vmem:[#allocation5 + $0xc] sm:$0xf]  ;;  %v1397_v18 = vor.u32 %v1556_v8, %v1396_v6  ;;  %942 = vmatpush.bf16.msrb.mxu0 %v1389_v14 }
  0xc2   :  { %v424_v32 = vadd.f32 %v416_v15, %v385_v24  ;;  %v1401_v21 = vor.u32 %v1554_v10, %v1398_v11  ;;  %v418_v24 = vperm.slane %v1903_v59, 3 }
  0xc3   :  { %v1253_v36 = vmul.f32 -1.442695, %v423_v29  ;;  %953 = vmatpush.bf16.msrb.mxu1 %v1425_v41  ;;  %968 = vmatpush.bf16.msrb.mxu2 %v1397_v18 }
  0xc4   :  { %v1254_v39 = vmul.f32 -1.442695, %v424_v32 }
  0xc5   :  { %1626 = vpow2.f32 %v1253_v36  ;;  %979 = vmatpush.bf16.msrb.mxu3 %v1433_v53 }
  0xc6   :  { %v397_v45 = vpop.f32.mrf.mxu2  ;;  %1628 = vpow2.f32 %v1254_v39  ;;  %v373_v52 = vpop.f32.mrf.mxu0 }
  0xc7   :  { %v398_v50 = vadd.f32 %v397_v45, %v1893_v40  ;;  %v410_v51 = vpop.f32.mrf.mxu3  ;;  %v386_v57 = vpop.f32.mrf.mxu1  ;;  %v1553_v40 = vld [vmem:[#allocation5 + $0x4] sm:$0xf]  ;;  %954 = vmatpush.bf16.msrb.mxu1 %v1409_v0 }
  0xc8   :  { %v1393_v17 = vor.u32 %v1553_v40, %v1390_v5  ;;  %v411_v23 = vadd.f32 %v410_v51, %v1898_v44 }
  0xc9   :  { %v425_v63 = vadd.f32 %v417_v30, %v398_v50  ;;  %980 = vmatpush.bf16.msrb.mxu3 %v1417_v4 }
  0xca   :  { %v426_v28 = vadd.f32 %v418_v24, %v411_v23 }
  0xcb   :  { %v1255_v9 = vmul.f32 -1.442695, %v425_v63  ;;  %v1627_v13 = vpop.eup %1626  ;;  %955 = vmatpush.bf16.msrb.mxu1 %v1393_v17 }
  0xcc   :  { %v1629_v15 = vpop.eup %1628  ;;  %v436_v16 = vadd.f32 1.0, %v1627_v13 }
  0xcd   :  { %1630 = vpow2.f32 %v1255_v9  ;;  %v437_v19 = vadd.f32 1.0, %v1629_v15  ;;  %981 = vmatpush.bf16.msrb.mxu3 %v1401_v21  ;;  %v556_v9 = vld [vmem:[%s1936_s8] sm:$0xf] }
  0xce   :  { %v399_v20 = vpop.f32.mrf.mxu2  ;;  %1632 = vrcp.f32 %v436_v16  ;;  %v450_v33 = vand.u32 2147483648, %v436_v16  ;;  %v448_v44 = vand.u32 2147483647, %v436_v16  ;;  %vm444_vm3 = vweird.f32 %v436_v16 }
  0xcf   :  { %v412_v22 = vpop.f32.mrf.mxu3  ;;  %1634 = vrcp.f32 %v437_v19  ;;  %v465_v34 = vand.u32 2147483648, %v437_v19  ;;  %v463_v36 = vand.u32 2147483647, %v437_v19  ;;  %vm459_vm4 = vweird.f32 %v437_v19 }
  0xd0   :  { %v451_v39 = vor.u32 1.1754944e-38, %v450_v33  ;;  %vm449_vm7 = vcmp.eq.f32.partialorder %v448_v44, 8.507059e+37  ;;  %v988_v10 = vperm.slane %v556_v9, 0  ;;  %v989_v11 = vperm.slane %v556_v9, 1 }
  0xd1   :  { %v466_v42 = vor.u32 1.1754944e-38, %v465_v34  ;;  %vm464_vm8 = vcmp.eq.f32.partialorder %v463_v36, 8.507059e+37  ;;  %v990_v21 = vperm.slane %v556_v9, 2 }
  0xd2   :  { %v732_v1 = vpop.f32.mrf.mxu0 }
  0xd3   :  { %v1631_v25 = vpop.eup %1630  ;;  %v745_v2 = vpop.f32.mrf.mxu1 }
  0xd4   :  { %v438_v26 = vadd.f32 1.0, %v1631_v25  ;;  %v1633_v27 = vpop.eup %1632 }
  0xd5   :  { %v1635_v29 = vpop.eup %1634  ;;  %v440_v30 = vmul.f32 %v1633_v27, %v436_v16  ;;  %vm445_vm1 = vweird.f32 %v1633_v27 }
  0xd6   :  { %1636 = vrcp.f32 %v438_v26  ;;  %v455_v31 = vmul.f32 %v1635_v29, %v437_v19  ;;  %vm460_vm2 = vweird.f32 %v1635_v29  ;;  %vm446_vm5 = vmor %vm444_vm3, %vm445_vm1  ;;  %v480_v56 = vand.u32 2147483648, %v438_v26 }
  0xd7   :  { %v441_v7 = vsub.f32 1.0, %v440_v30  ;;  %1638 = vtanh.f32 %v426_v28  ;;  %vm461_vm6 = vmor %vm459_vm4, %vm460_vm2  ;;  %vm474_vm10 = vweird.f32 %v438_v26  ;;  %v478_v57 = vand.u32 2147483647, %v438_v26 }
  0xd8   :  { %v456_v32 = vsub.f32 1.0, %v455_v31  ;;  %v481_v60 = vor.u32 1.1754944e-38, %v480_v56  ;;  %v1257_v56 = vld [vmem:[%s1930_s2 + $0x8] sm:$0xff]  ;;  %s1792_s2 = smov 128  }
  0xd9   :  { %v442_v35 = vmul.f32 %v1633_v27, %v441_v7  ;;  %vm479_vm12 = vcmp.eq.f32.partialorder %v478_v57, 8.507059e+37 }
  0xda   :  { %v457_v59 = vmul.f32 %v1635_v29, %v456_v32  ;;  %v758_v3 = vpop.f32.mrf.mxu2  ;;  %v734_v40 = vpop.f32.mrf.mxu0 }
  0xdb   :  { %v443_v12 = vadd.f32 %v1633_v27, %v442_v35  ;;  %v771_v4 = vpop.f32.mrf.mxu3  ;;  %v747_v5 = vpop.f32.mrf.mxu1  ;;  %v991_v35 = vperm.slane %v556_v9, 3 }
  0xdc   :  { %v1637_v37 = vpop.eup %1636  ;;  %v458_v41 = vadd.f32 %v1635_v29, %v457_v59 }
  0xdd   :  { %v470_v38 = vmul.f32 %v1637_v37, %v438_v26  ;;  %v447_v45 = vsel %vm446_vm5, %v1633_v27, %v443_v12  ;;  %v1639_v46 = vpop.eup %1638  ;;  %vm475_vm9 = vweird.f32 %v1637_v37 }
  0xde   :  { %v452_v48 = vsel %vm449_vm7, %v451_v39, %v447_v45  ;;  %v462_v49 = vsel %vm461_vm6, %v1635_v29, %v458_v41  ;;  %vm476_vm11 = vmor %vm474_vm10, %vm475_vm9 }
  0xdf   :  { %v471_v47 = vsub.f32 1.0, %v470_v38  ;;  %v467_v50 = vsel %vm464_vm8, %v466_v42, %v462_v49  ;;  %v486_v51 = vmul.f32 %v1639_v46, %v452_v48 }
  0xe0   :  { %v485_v52 = vmul.f32 %v467_v50, %v123_v43 }
  0xe1   :  { %v472_v53 = vmul.f32 %v1637_v37, %v471_v47 }
  0xe2   :  { %v487_v54 = vadd.f32 %v486_v51, %v485_v52  ;;  %v760_v6 = vpop.f32.mrf.mxu2 }
  0xe3   :  { %v473_v55 = vadd.f32 %v1637_v37, %v472_v53  ;;  %v773_v8 = vpop.f32.mrf.mxu3 }
  0xe4   :  { %1640 = vtanh.f32 %v487_v54  ;;  %491 = vst [vmem:[#allocation9] sm:$0xff] %v487_v54 }
  0xe5   :  { %v477_v58 = vsel %vm476_vm11, %v1637_v37, %v473_v55 }
  0xe6   :  { %v482_v62 = vsel %vm479_vm12, %v481_v60, %v477_v58 }
  0xea   :  { %v1641_v61 = vpop.eup %1640 }
  0xeb   :  { %v489_v63 = vmul.f32 %v1641_v61, %v482_v62 }
  0xed   :  { %490 = vst [vmem:[#allocation8] sm:$0xff] %v489_v63  ;;  %v561_v0 = vpack.c.bf16 %v489_v63, %v489_v63 }
  0xef   :  { %943 = vmatmul.bf16.vlgmr.msrb.gmra.mxu0 %v561_v0  ;;  %956 = vmatmul.bf16.vlgmr.msrb.gmra.mxu1 %v561_v0 }
  0xf0   :  { %969 = vmatmul.bf16.vlgmr.msrb.gmra.mxu2 %v561_v0  ;;  %982 = vmatmul.bf16.vlgmr.msrb.gmra.mxu3 %v561_v0 }
 0x16c   :  { %v944_v13 = vpop.f32.mrf.mxu0  ;;  %v957_v14 = vpop.f32.mrf.mxu1 }
 0x16d   :  { %v945_v15 = vadd.f32 %v944_v13, %v732_v1  ;;  %v958_v16 = vadd.f32 %v957_v14, %v745_v2 }
 0x16f   :  { %v996_v17 = vadd.f32 %v988_v10, %v945_v15  ;;  %v997_v18 = vadd.f32 %v989_v11, %v958_v16 }
 0x171   :  { %v1514_v19 = vmul.f32 -1.442695, %v996_v17  ;;  %v1515_v20 = vmul.f32 -1.442695, %v997_v18 }
 0x173   :  { %1642 = vpow2.f32 %v1514_v19  ;;  %v970_v22 = vpop.f32.mrf.mxu2  ;;  %v983_v23 = vpop.f32.mrf.mxu3 }
 0x174   :  { %1644 = vpow2.f32 %v1515_v20  ;;  %v971_v24 = vadd.f32 %v970_v22, %v758_v3  ;;  %v946_v25 = vpop.f32.mrf.mxu0  ;;  %v959_v26 = vpop.f32.mrf.mxu1  ;;  %v984_v34 = vadd.f32 %v983_v23, %v771_v4 }
 0x176   :  { %v998_v27 = vadd.f32 %v990_v21, %v971_v24  ;;  %v999_v37 = vadd.f32 %v991_v35, %v984_v34 }
 0x178   :  { %v1516_v28 = vmul.f32 -1.442695, %v998_v27 }
 0x179   :  { %v1643_v29 = vpop.eup %1642 }
 0x17a   :  { %v1645_v30 = vpop.eup %1644  ;;  %v1009_v31 = vadd.f32 1.0, %v1643_v29  ;;  %1646 = vpow2.f32 %v1516_v28 }
 0x17b   :  { %v1010_v7 = vadd.f32 1.0, %v1645_v30  ;;  %v972_v32 = vpop.f32.mrf.mxu2  ;;  %v985_v33 = vpop.f32.mrf.mxu3 }
 0x17c   :  { %1648 = vrcp.f32 %v1009_v31  ;;  %v1023_v43 = vand.u32 2147483648, %v1009_v31  ;;  %v1021_v47 = vand.u32 2147483647, %v1009_v31  ;;  %vm1017_vm15 = vweird.f32 %v1009_v31 }
 0x17d   :  { %1650 = vrcp.f32 %v1010_v7  ;;  %v1038_v45 = vand.u32 2147483648, %v1010_v7  ;;  %v1036_v49 = vand.u32 2147483647, %v1010_v7  ;;  %vm1032_vm0 = vweird.f32 %v1010_v7 }
 0x17e   :  { %v1024_v53 = vor.u32 1.1754944e-38, %v1023_v43  ;;  %vm1022_vm3 = vcmp.eq.f32.partialorder %v1021_v47, 8.507059e+37 }
 0x17f   :  { %v1039_v55 = vor.u32 1.1754944e-38, %v1038_v45  ;;  %vm1037_vm4 = vcmp.eq.f32.partialorder %v1036_v49, 8.507059e+37 }
 0x180   :  { %v1647_v44 = vpop.eup %1646 }
 0x181   :  { %v1011_v59 = vadd.f32 1.0, %v1647_v44 }
 0x182   :  { %v1649_v36 = vpop.eup %1648 }
 0x183   :  { %v1651_v12 = vpop.eup %1650  ;;  %v1013_v38 = vmul.f32 %v1649_v36, %v1009_v31  ;;  %1652 = vrcp.f32 %v1011_v59  ;;  %vm1018_vm13 = vweird.f32 %v1649_v36  ;;  %v1053_v4 = vand.u32 2147483648, %v1011_v59 }
 0x184   :  { %v1028_v39 = vmul.f32 %v1651_v12, %v1010_v7  ;;  %1654 = vtanh.f32 %v999_v37  ;;  %vm1033_vm14 = vweird.f32 %v1651_v12  ;;  %vm1019_vm1 = vmor %vm1017_vm15, %vm1018_vm13  ;;  %vm1047_vm6 = vweird.f32 %v1011_v59 }
 0x185   :  { %v1014_v41 = vsub.f32 1.0, %v1013_v38  ;;  %vm1034_vm2 = vmor %vm1032_vm0, %vm1033_vm14  ;;  %v1051_v5 = vand.u32 2147483647, %v1011_v59  ;;  %v1054_v8 = vor.u32 1.1754944e-38, %v1053_v4 }
 0x186   :  { %v1029_v42 = vsub.f32 1.0, %v1028_v39 }
 0x187   :  { %v1015_v46 = vmul.f32 %v1649_v36, %v1014_v41  ;;  %vm1052_vm8 = vcmp.eq.f32.partialorder %v1051_v5, 8.507059e+37 }
 0x188   :  { %v1030_v48 = vmul.f32 %v1651_v12, %v1029_v42 }
 0x189   :  { %v1653_v50 = vpop.eup %1652  ;;  %v1016_v51 = vadd.f32 %v1649_v36, %v1015_v46 }
 0x18a   :  { %v1043_v52 = vmul.f32 %v1653_v50, %v1011_v59  ;;  %v1031_v54 = vadd.f32 %v1651_v12, %v1030_v48  ;;  %v1655_v58 = vpop.eup %1654  ;;  %vm1048_vm5 = vweird.f32 %v1653_v50 }
 0x18b   :  { %v1020_v57 = vsel %vm1019_vm1, %v1649_v36, %v1016_v51  ;;  %vm1049_vm7 = vmor %vm1047_vm6, %vm1048_vm5 }
 0x18c   :  { %v1044_v60 = vsub.f32 1.0, %v1043_v52  ;;  %v1025_v61 = vsel %vm1022_vm3, %v1024_v53, %v1020_v57  ;;  %v1035_v62 = vsel %vm1034_vm2, %v1651_v12, %v1031_v54 }
 0x18d   :  { %v1040_v63 = vsel %vm1037_vm4, %v1039_v55, %v1035_v62  ;;  %v1059_v0 = vmul.f32 %v1655_v58, %v1025_v61 }
 0x18e   :  { %v1045_v1 = vmul.f32 %v1653_v50, %v1044_v60  ;;  %v1058_v2 = vmul.f32 %v1257_v56, %v1040_v63 }
 0x190   :  { %v1060_v3 = vadd.f32 %v1059_v0, %v1058_v2  ;;  %v1046_v40 = vadd.f32 %v1653_v50, %v1045_v1 }
 0x192   :  { %1656 = vtanh.f32 %v1060_v3  ;;  %1066 = vst [vmem:[#allocation9 + $0x8] sm:$0xff] %v1060_v3  ;;  %v1050_v6 = vsel %vm1049_vm7, %v1653_v50, %v1046_v40 }
 0x193   :  { %1092 = dma.vmem_to_hbm [thread:$0]  %s1085_s30, 256, %s1087_s13, [#allocation10], %s1792_s2, %s1792_s2, %s1793_s14   ;;  %v1055_v10 = vsel %vm1052_vm8, %v1054_v8, %v1050_v6 }
 0x198   :  { %v1657_v9 = vpop.eup %1656 }
 0x199   :  { %v1062_v11 = vmul.f32 %v1657_v9, %v1055_v10 }
 0x19b   :  { %1064 = vst [vmem:[#allocation8 + $0x8] sm:$0xff] %v1062_v11 }
 0x19c   :  { %1079 = dma.vmem_to_hbm [thread:$0]  %s1072_s10, 256, %s1074_s18, [#allocation4], %s1792_s2, %s1792_s2, %s1793_s14  }
 0x19d   :  { %1782 = dma.done.wait [#allocation4], 256  }
 0x19e   :  { %1783 = vsyncadd [#allocation4], 4294967040 }
 0x19f   :  { %1784 = dma.done.wait [#allocation10], 256  }
 0x1a0   :  { %1785 = vsyncadd [#allocation10], 4294967040 }
 0x1a1   :  { %1101 = vsyncpa [#allocation3], 1 }
 0x1a2   :  { %1102 = vsyncpa [#allocation6], 1 }
 0x1a3   :  { %1103 = vsyncpa [#allocation4], 1 }
 0x1a4   :  { %1104 = vsyncpa [#allocation10], 1 }

</bundles_post_ra>
